<compile_context>
chip_gen: v7x
topology: tpu7x:2x2x1
jax: 0.10.0
libtpu: 0.0.40
codegen_flags: <defaults>
</compile_context>

<pallas_src>
import jax
import jax.numpy as jnp
import numpy as np
from jax.experimental import pallas as pl
from jax.experimental.pallas import tpu as pltpu


def _yolo_kernel(add_ref, scal_ref, x_ref, out_ref):
    # add_ref:  VMEM [2, HWp]       (grid_x - off)/W , (grid_y - off)/H
    # scal_ref: VMEM [1+A, 2, 1]    row 0: (sxy/W, sxy/H); rows 1..: (aw/W, ah/H)
    # x_ref:    VMEM [B, A, 5+C, HWp]  raw head activations
    # out_ref:  VMEM [B, A, 4+C, HWp]  rows 0..3 -> (bx1, by1, bx2, by2), 4.. -> confs
    x = x_ref[...]                       # single full-tile load; slice in vregs
    add = add_ref[...]                   # [2, HWp]
    scal = scal_ref[...]                 # [1+A, 2, 1]

    mul_xy = scal[0][None, None, :, :]   # [1,1,2,1]   scale_x_y / (W, H)
    awh = scal[1:][None, :, :, :]        # [1,A,2,1]   anchor_w/W, anchor_h/H

    # Transcendentals ride the EUP slot; the rest is a handful of VPU FMAs.
    bcxy = jax.nn.sigmoid(x[:, :, 0:2, :]) * mul_xy + add[None, None]   # [B,A,2,HWp]
    bwh = jnp.exp(x[:, :, 2:4, :]) * awh                                # [B,A,2,HWp]
    sconf = jax.nn.sigmoid(x[:, :, 4:, :])                              # [B,A,1+C,HWp]

    b1 = bcxy - 0.5 * bwh                # (bx1, by1)
    b2 = b1 + bwh                        # (bx2, by2)
    confs = sconf[:, :, 1:, :] * sconf[:, :, 0:1, :]                    # cls * obj

    # Single unmasked store of the full 8-sublane output tile.
    out_ref[...] = jnp.concatenate([b1, b2, confs], axis=2)


def yolo_forward_slab(x, masked_anchors, num_classes, scale_x_y=1.0):
    """Runs the Pallas kernel; returns the lane-dense slab [B, A, 4+C, H*W]."""
    B, Ctot, H, W = x.shape
    A = len(masked_anchors) // 2
    C = num_classes
    assert Ctot == A * (5 + C)
    HW = H * W
    HWp = max(128, ((HW + 127) // 128) * 128)   # keep the lane axis 128-dense

    # Free, contiguous reshape NCHW -> [B, A, 5+C, H*W]; pad lanes if needed.
    x5 = x.reshape(B, A, 5 + C, HW)
    if HWp != HW:
        x5 = jnp.pad(x5, ((0, 0), (0, 0), (0, 0), (0, HWp - HW)))

    # Host-side (static) coefficients: fold scale_x_y, grid offsets, 1/W, 1/H
    # and the anchors into one [2, HWp] adder and a [1+A, 2, 1] scalar table.
    sxy = float(scale_x_y)
    off = 0.5 * (sxy - 1.0)
    gx = np.tile(np.arange(W, dtype=np.float64), H)      # grid_x, row-major
    gy = np.repeat(np.arange(H, dtype=np.float64), W)    # grid_y
    add = np.zeros((2, HWp), np.float64)
    add[0, :HW] = (gx - off) / W
    add[1, :HW] = (gy - off) / H
    add = jnp.asarray(add, jnp.float32)

    scal = np.zeros((1 + A, 2, 1), np.float64)
    scal[0, 0, 0] = sxy / W
    scal[0, 1, 0] = sxy / H
    for a in range(A):
        scal[1 + a, 0, 0] = float(masked_anchors[2 * a]) / W
        scal[1 + a, 1, 0] = float(masked_anchors[2 * a + 1]) / H
    scal = jnp.asarray(scal, jnp.float32)

    out = pl.pallas_call(
        _yolo_kernel,
        out_shape=jax.ShapeDtypeStruct((B, A, 4 + C, HWp), jnp.float32),
        in_specs=[
            pl.BlockSpec(memory_space=pltpu.MemorySpace.VMEM),
            pl.BlockSpec(memory_space=pltpu.MemorySpace.VMEM),
            pl.BlockSpec(memory_space=pltpu.MemorySpace.VMEM),
        ],
        out_specs=pl.BlockSpec(memory_space=pltpu.MemorySpace.VMEM),
    )(add, scal, x5)

    return out[..., :HW] if HWp != HW else out


def yolo_forward(x, masked_anchors, num_classes, scale_x_y=1.0):
    """Pallas implementation of yolo_forward_dynamic (inference path)."""
    B, _, H, W = x.shape
    A = len(masked_anchors) // 2
    HW = H * W
    slab = yolo_forward_slab(x, masked_anchors, num_classes, scale_x_y)
    # Layout-only glue to the exact PyTorch output shapes.  In a real pipeline
    # the NMS / threshold consumer should be fused on the lane-dense slab
    # instead of materialising these narrow-lane (4-wide / C-wide) arrays.
    boxes = (slab[:, :, 0:4, :]
             .transpose(0, 1, 3, 2)
             .reshape(B, A * HW, 1, 4))
    confs = (slab[:, :, 4:, :]
             .transpose(0, 1, 3, 2)
             .reshape(B, A * HW, num_classes))
    return boxes, confs


def yolo_reference(x, masked_anchors, num_classes, scale_x_y=1.0):
    """Pure-JAX mirror of the PyTorch yolo_forward_dynamic, for verification."""
    B, Ctot, H, W = x.shape
    A = len(masked_anchors) // 2
    x5 = x.reshape(B, A, 5 + num_classes, H, W)
    bxy = jax.nn.sigmoid(x5[:, :, 0:2]) * scale_x_y - 0.5 * (scale_x_y - 1)
    bwh = jnp.exp(x5[:, :, 2:4])
    gx = jnp.arange(W, dtype=jnp.float32)[None, None, None, :]
    gy = jnp.arange(H, dtype=jnp.float32)[None, None, :, None]
    aw = jnp.asarray(masked_anchors[0::2], jnp.float32)[None, :, None, None]
    ah = jnp.asarray(masked_anchors[1::2], jnp.float32)[None, :, None, None]
    bx = (bxy[:, :, 0] + gx) / W
    by = (bxy[:, :, 1] + gy) / H
    bw = bwh[:, :, 0] * aw / W
    bh = bwh[:, :, 1] * ah / H
    bx1 = bx - bw * 0.5
    by1 = by - bh * 0.5
    bx2 = bx1 + bw
    by2 = by1 + bh
    boxes = jnp.stack([bx1, by1, bx2, by2], axis=-1).reshape(B, A * H * W, 1, 4)
    det = jax.nn.sigmoid(x5[:, :, 4])[..., None]
    cls = jnp.transpose(jax.nn.sigmoid(x5[:, :, 5:]), (0, 1, 3, 4, 2))
    confs = (cls * det).reshape(B, A * H * W, num_classes)
    return boxes, confs


if __name__ == "__main__":
    # Module __init__ parameters (deterministic, in-script; no checkpoint load)
    B, H, W = 2, 16, 16
    num_classes = 4
    anchor_mask = [0, 1, 2]
    anchors = [12, 16, 19, 36, 40, 28, 36, 75, 76, 55, 72, 146]
    num_anchors = 6
    anchor_step = len(anchors) // num_anchors
    stride = 8
    scale_x_y = 1.0

    masked_anchors = []
    for m in anchor_mask:
        masked_anchors += anchors[m * anchor_step:(m + 1) * anchor_step]
    masked_anchors = [a / stride for a in masked_anchors]
    A = len(anchor_mask)

    key = jax.random.PRNGKey(0)
    x = jax.random.normal(key, (B, A * (5 + num_classes), H, W), dtype=jnp.float32)

    boxes, confs = yolo_forward(x, masked_anchors, num_classes, scale_x_y)
    jax.block_until_ready((boxes, confs))

    assert boxes.shape == (B, A * H * W, 1, 4)
    assert confs.shape == (B, A * H * W, num_classes)

    ref_boxes, ref_confs = yolo_reference(x, masked_anchors, num_classes, scale_x_y)
    np.testing.assert_allclose(np.asarray(boxes), np.asarray(ref_boxes),
                               rtol=1e-5, atol=1e-5)
    np.testing.assert_allclose(np.asarray(confs), np.asarray(ref_confs),
                               rtol=1e-5, atol=1e-5)

    print("KERNEL_OK")
</pallas_src>

<mosaic_0001>
module attributes {stable_mosaic.version = 11 : i64} {
  func.func @_yolo_kernel(%arg0: memref<2x256xf32, #tpu.memory_space<vmem>>, %arg1: memref<4x2x1xf32, #tpu.memory_space<vmem>>, %arg2: memref<2x3x9x256xf32, #tpu.memory_space<vmem>>, %arg3: memref<2x3x8x256xf32, #tpu.memory_space<vmem>>) attributes {dimension_semantics = [], scalar_prefetch = 0 : i64, scratch_operands = 0 : i64, tpu.core_type = #tpu.core_type<tc>} {
    %c0 = arith.constant 0 : index
    %c0_0 = arith.constant 0 : index
    %c0_1 = arith.constant 0 : index
    %c0_2 = arith.constant 0 : index
    %0 = vector.load %arg2[%c0, %c0_0, %c0_1, %c0_2] : memref<2x3x9x256xf32, #tpu.memory_space<vmem>>, vector<2x3x9x256xf32>
    %c0_3 = arith.constant 0 : index
    %c0_4 = arith.constant 0 : index
    %1 = vector.load %arg0[%c0_3, %c0_4] : memref<2x256xf32, #tpu.memory_space<vmem>>, vector<2x256xf32>
    %c0_5 = arith.constant 0 : index
    %c0_6 = arith.constant 0 : index
    %c0_7 = arith.constant 0 : index
    %2 = vector.load %arg1[%c0_5, %c0_6, %c0_7] : memref<4x2x1xf32, #tpu.memory_space<vmem>>, vector<4x2x1xf32>
    %3 = vector.extract_strided_slice %2 {offsets = [0, 0, 0], sizes = [1, 2, 1], strides = [1, 1, 1]} : vector<4x2x1xf32> to vector<1x2x1xf32>
    %4 = vector.shape_cast %3 : vector<1x2x1xf32> to vector<2x1xf32>
    %5 = vector.shape_cast %4 : vector<2x1xf32> to vector<1x1x2x1xf32>
    %6 = vector.extract_strided_slice %2 {offsets = [1, 0, 0], sizes = [3, 2, 1], strides = [1, 1, 1]} : vector<4x2x1xf32> to vector<3x2x1xf32>
    %7 = vector.shape_cast %6 : vector<3x2x1xf32> to vector<1x3x2x1xf32>
    %8 = vector.extract_strided_slice %0 {offsets = [0, 0, 0, 0], sizes = [2, 3, 2, 256], strides = [1, 1, 1, 1]} : vector<2x3x9x256xf32> to vector<2x3x2x256xf32>
    %9 = arith.negf %8 : vector<2x3x2x256xf32>
    %10 = math.exp %9 : vector<2x3x2x256xf32>
    %cst = arith.constant 1.000000e+00 : f32
    %11 = vector.broadcast %cst : f32 to vector<2x3x2x256xf32>
    %12 = arith.addf %11, %10 : vector<2x3x2x256xf32>
    %13 = arith.divf %11, %12 : vector<2x3x2x256xf32>
    %14 = vector.broadcast %5 : vector<1x1x2x1xf32> to vector<2x3x2x256xf32>
    %15 = arith.mulf %13, %14 : vector<2x3x2x256xf32>
    %16 = vector.shape_cast %1 : vector<2x256xf32> to vector<1x1x2x256xf32>
    %17 = vector.broadcast %16 : vector<1x1x2x256xf32> to vector<2x3x2x256xf32>
    %18 = arith.addf %15, %17 : vector<2x3x2x256xf32>
    %19 = vector.extract_strided_slice %0 {offsets = [0, 0, 2, 0], sizes = [2, 3, 2, 256], strides = [1, 1, 1, 1]} : vector<2x3x9x256xf32> to vector<2x3x2x256xf32>
    %20 = math.exp %19 : vector<2x3x2x256xf32>
    %21 = vector.broadcast %7 : vector<1x3x2x1xf32> to vector<2x3x2x256xf32>
    %22 = arith.mulf %20, %21 : vector<2x3x2x256xf32>
    %23 = vector.extract_strided_slice %0 {offsets = [0, 0, 4, 0], sizes = [2, 3, 5, 256], strides = [1, 1, 1, 1]} : vector<2x3x9x256xf32> to vector<2x3x5x256xf32>
    %24 = arith.negf %23 : vector<2x3x5x256xf32>
    %25 = math.exp %24 : vector<2x3x5x256xf32>
    %cst_8 = arith.constant 1.000000e+00 : f32
    %26 = vector.broadcast %cst_8 : f32 to vector<2x3x5x256xf32>
    %27 = arith.addf %26, %25 : vector<2x3x5x256xf32>
    %28 = arith.divf %26, %27 : vector<2x3x5x256xf32>
    %cst_9 = arith.constant 5.000000e-01 : f32
    %29 = vector.broadcast %cst_9 : f32 to vector<2x3x2x256xf32>
    %30 = arith.mulf %29, %22 : vector<2x3x2x256xf32>
    %31 = arith.subf %18, %30 : vector<2x3x2x256xf32>
    %32 = arith.addf %31, %22 : vector<2x3x2x256xf32>
    %33 = vector.extract_strided_slice %28 {offsets = [0, 0, 1, 0], sizes = [2, 3, 4, 256], strides = [1, 1, 1, 1]} : vector<2x3x5x256xf32> to vector<2x3x4x256xf32>
    %34 = vector.extract_strided_slice %28 {offsets = [0, 0, 0, 0], sizes = [2, 3, 1, 256], strides = [1, 1, 1, 1]} : vector<2x3x5x256xf32> to vector<2x3x1x256xf32>
    %35 = vector.broadcast %34 : vector<2x3x1x256xf32> to vector<2x3x4x256xf32>
    %36 = arith.mulf %33, %35 : vector<2x3x4x256xf32>
    %37 = tpu.concatenate %31, %32, %36 in 2 : vector<2x3x2x256xf32>, vector<2x3x2x256xf32>, vector<2x3x4x256xf32> -> vector<2x3x8x256xf32>
    %c0_10 = arith.constant 0 : index
    %c0_11 = arith.constant 0 : index
    %c0_12 = arith.constant 0 : index
    %c0_13 = arith.constant 0 : index
    %38 = vector.load %arg3[%c0_10, %c0_11, %c0_12, %c0_13] : memref<2x3x8x256xf32, #tpu.memory_space<vmem>>, vector<2x3x8x256xf32>
    tpu.vector_store %arg3[%c0_10, %c0_11, %c0_12, %c0_13], %37 {strides = array<i32>} : memref<2x3x8x256xf32, #tpu.memory_space<vmem>>, vector<2x3x8x256xf32>,
    return
  }
}

</mosaic_0001>

<bundles_post_ra>
// kernel: tpu_custom_call.1
= control target key start
LH: loop header
LB: loop body
LE: loop exit
PB: predicated region body
PF: predicated region fallthrough
CT: control target
= control target key end

     0   :  { %v800_v2 = vmov 0   ;;  %s1249_s0 = inlined_call_operand.vmem [shape: f32[2,256], index: 0, kind: input, shape index: {}]   ;;  %s1250_s1 = inlined_call_operand.vmem [shape: f32[4,2,1], index: 1, kind: input, shape index: {}]   ;;  %s1251_s2 = inlined_call_operand.vmem [shape: f32[2,3,9,256], index: 2, kind: input, shape index: {}]   ;;  %s1252_s3 = inlined_call_operand.hbm [shape: f32[2,3,8,256], index: 3, kind: output, shape index: {}]  }
   0x1   :  { %v43_v0 = vld [vmem:[%s1250_s1 + $0x6] sm:$0x3]  ;;  %v41_v1 = vld [vmem:[%s1250_s1 + $0x2] sm:$0x3]  ;;  %655 = vset.pattern.permute.xlu1 %v800_v2  ;;  %654 = vset.pattern.permute.xlu0 %v800_v2  ;;  %v42_v3 = vld [vmem:[%s1250_s1 + $0x4] sm:$0x3] }
   0x2   :  { %190 = vperm.xlu1 %655, %v43_v0   ;;  %182 = vperm.xlu0 %654, %v41_v1   ;;  %v40_v4 = vld [vmem:[%s1250_s1] sm:$0x3] }
   0x6   :  { %186 = vperm.xlu0 %654, %v42_v3   ;;  %118 = vperm.xlu1 %655, %v40_v4  }
   0x7   :  { %8 = vsyncpa [#allocation3], 0  ;;  %v23_v5 = vld [vmem:[%s1251_s2 + $0x40] sm:$0xff]  ;;  %v24_v6 = vld [vmem:[%s1251_s2 + $0x48] sm:$0xff]  ;;  %vm522_vm0 = vcmask 1046528   ;;  %vm571_vm1 = vcmask 1041408  }
   0x8   :  { %v35_v7 = vld [vmem:[%s1251_s2 + $0xa0] sm:$0xff]  ;;  %v36_v8 = vld [vmem:[%s1251_s2 + $0xa8] sm:$0xff]  ;;  %v629_v9 = vmul.f32 -1.442695, %v23_v5  ;;  %v630_v10 = vmul.f32 -1.442695, %v24_v6 }
   0x9   :  { %v635_v11 = vmul.f32 -1.442695, %v35_v7  ;;  %v636_v12 = vmul.f32 -1.442695, %v36_v8  ;;  %v25_v13 = vld [vmem:[%s1251_s2 + $0x50] sm:$0x1] }
   0xa   :  { %656 = vpow2.f32 %v629_v9  ;;  %v26_v14 = vld [vmem:[%s1251_s2 + $0x58] sm:$0x1]  ;;  %v37_v15 = vld [vmem:[%s1251_s2 + $0xb0] sm:$0x1]  ;;  %v642_v16 = vmul.f32 -1.442695, %v25_v13 }
   0xb   :  { %658 = vpow2.f32 %v630_v10  ;;  %v643_v17 = vmul.f32 -1.442695, %v26_v14  ;;  %v648_v18 = vmul.f32 -1.442695, %v37_v15  ;;  %v164_v19 = vmul.f32 1.442695, %v23_v5 }
   0xc   :  { %660 = vpow2.f32 %v635_v11  ;;  %v38_v20 = vld [vmem:[%s1251_s2 + $0xb8] sm:$0x1]  ;;  %v166_v21 = vmul.f32 1.442695, %v24_v6  ;;  %v176_v22 = vmul.f32 1.442695, %v35_v7 }
   0xd   :  { %662 = vpow2.f32 %v636_v12  ;;  %v863_v23 = vld [vmem:[%s1251_s2] sm:$0xff]  ;;  %v178_v25 = vmul.f32 1.442695, %v36_v8  ;;  %v649_v27 = vmul.f32 -1.442695, %v38_v20  ;;  %v869_v33 = vld [vmem:[%s1251_s2 + $0x8] sm:$0xff] }
   0xe   :  { %664 = vpow2.f32 %v642_v16  ;;  %v625_v29 = vmul.f32 -1.442695, %v863_v23  ;;  %v874_v35 = vld [vmem:[%s1251_s2 + $0x60] sm:$0xff]  ;;  %v879_v37 = vld [vmem:[%s1251_s2 + $0x68] sm:$0xff]  ;;  %v626_v39 = vmul.f32 -1.442695, %v869_v33 }
   0xf   :  { %666 = vpow2.f32 %v643_v17  ;;  %v631_v41 = vmul.f32 -1.442695, %v874_v35  ;;  %v632_v43 = vmul.f32 -1.442695, %v879_v37  ;;  %v17_v45 = vld [vmem:[%s1251_s2 + $0x10] sm:$0x1] }
  0x10   :  { %668 = vpow2.f32 %v648_v18  ;;  %v18_v48 = vld [vmem:[%s1251_s2 + $0x18] sm:$0x1]  ;;  %v29_v51 = vld [vmem:[%s1251_s2 + $0x70] sm:$0x1]  ;;  %v638_v54 = vmul.f32 -1.442695, %v17_v45 }
  0x11   :  { %670 = vpow2.f32 %v164_v19  ;;  %v30_v53 = vld [vmem:[%s1251_s2 + $0x78] sm:$0x1]  ;;  %v639_v56 = vmul.f32 -1.442695, %v18_v48  ;;  %v907_v57 = vld [vmem:[%s1251_s2 + $0x20] sm:$0xff]  ;;  %v912_v60 = vld [vmem:[%s1251_s2 + $0x28] sm:$0xff] }
  0x12   :  { %672 = vpow2.f32 %v166_v21  ;;  %v644_v59 = vmul.f32 -1.442695, %v29_v51  ;;  %v645_v62 = vmul.f32 -1.442695, %v30_v53  ;;  %v917_v63 = vld [vmem:[%s1251_s2 + $0x80] sm:$0xff]  ;;  %v924_v1 = vld [vmem:[%s1251_s2 + $0x88] sm:$0xff] }
  0x13   :  { %674 = vpow2.f32 %v176_v22  ;;  %v627_v2 = vmul.f32 -1.442695, %v907_v57  ;;  %v21_v4 = vld [vmem:[%s1251_s2 + $0x30] sm:$0x1]  ;;  %v628_v5 = vmul.f32 -1.442695, %v912_v60 }
  0x14   :  { %v657_v24 = vpop.eup %656  ;;  %676 = vpow2.f32 %v178_v25  ;;  %v22_v7 = vld [vmem:[%s1251_s2 + $0x38] sm:$0x1]  ;;  %v633_v8 = vmul.f32 -1.442695, %v917_v63  ;;  %v33_v10 = vld [vmem:[%s1251_s2 + $0x90] sm:$0x1] }
  0x15   :  { %v659_v26 = vpop.eup %658  ;;  %v84_v31 = vadd.f32 1.0, %v657_v24  ;;  %678 = vpow2.f32 %v649_v27  ;;  %v634_v11 = vmul.f32 -1.442695, %v924_v1  ;;  %v34_v13 = vld [vmem:[%s1251_s2 + $0x98] sm:$0x1]  ;;  %vm584_vm2 = vcmask 1043456  }
  0x16   :  { %v661_v28 = vpop.eup %660  ;;  %v85_v32 = vadd.f32 1.0, %v659_v26  ;;  %680 = vpow2.f32 %v625_v29  ;;  %v640_v14 = vmul.f32 -1.442695, %v21_v4  ;;  %v641_v16 = vmul.f32 -1.442695, %v22_v7 }
  0x17   :  { %v663_v30 = vpop.eup %662  ;;  %v90_v34 = vadd.f32 1.0, %v661_v28  ;;  %682 = vrcp.f32 %v84_v31  ;;  %v646_v18 = vmul.f32 -1.442695, %v33_v10  ;;  %v647_v20 = vmul.f32 -1.442695, %v34_v13 }
  0x18   :  { %v91_v36 = vadd.f32 1.0, %v663_v30  ;;  %v665_v38 = vpop.eup %664  ;;  %684 = vrcp.f32 %v85_v32  ;;  %v390_v31 = vlaneseq }
  0x19   :  { %v667_v40 = vpop.eup %666  ;;  %686 = vrcp.f32 %v90_v34  ;;  %v250_v44 = vadd.f32 1.0, %v665_v38 }
  0x1a   :  { %v669_v42 = vpop.eup %668  ;;  %688 = vrcp.f32 %v91_v36  ;;  %v251_v47 = vadd.f32 1.0, %v667_v40 }
  0x1b   :  { %v887_v46 = vpop.eup %670  ;;  %690 = vpow2.f32 %v626_v39  ;;  %v256_v50 = vadd.f32 1.0, %v669_v42 }
  0x1c   :  { %v892_v49 = vpop.eup %672  ;;  %692 = vpow2.f32 %v631_v41 }
  0x1d   :  { %v897_v52 = vpop.eup %674  ;;  %694 = vpow2.f32 %v632_v43  ;;  %v391_v43 = vshrl.u32 %v390_v31, 7 }
  0x1e   :  { %v902_v55 = vpop.eup %676  ;;  %696 = vrcp.f32 %v250_v44 }
  0x1f   :  { %v679_v58 = vpop.eup %678  ;;  %698 = vrcp.f32 %v251_v47 }
  0x20   :  { %v681_v61 = vpop.eup %680  ;;  %700 = vrcp.f32 %v256_v50  ;;  %v257_v22 = vadd.f32 1.0, %v679_v58 }
  0x21   :  { %v919_v0 = vpop.eup %682  ;;  %702 = vpow2.f32 %v638_v54  ;;  %v80_v25 = vadd.f32 1.0, %v681_v61 }
  0x22   :  { %v927_v3 = vpop.eup %684  ;;  %704 = vpow2.f32 %v639_v56  ;;  %v954_v56 = vsub.s32 4, %v391_v43 }
  0x23   :  { %v933_v6 = vpop.eup %686  ;;  %706 = vpow2.f32 %v644_v59 }
  0x24   :  { %1260 = vst [vmem:[#allocation5_spill] sm:$0xff] %v933_v6  ;;  %v939_v9 = vpop.eup %688  ;;  %708 = vpow2.f32 %v645_v62 }
  0x25   :  { %1261 = vst [vmem:[#allocation6_spill] sm:$0xff] %v939_v9  ;;  %v691_v12 = vpop.eup %690  ;;  %710 = vpow2.f32 %v627_v2 }
  0x26   :  { %v693_v15 = vpop.eup %692  ;;  %712 = vpow2.f32 %v628_v5  ;;  %v81_v27 = vadd.f32 1.0, %v691_v12  ;;  %v156_v12 = vmul.f32 1.442695, %v863_v23 }
  0x27   :  { %v695_v17 = vpop.eup %694  ;;  %714 = vpow2.f32 %v633_v8  ;;  %v86_v29 = vadd.f32 1.0, %v693_v15  ;;  %v409_v8 = vrot.slane %v919_v0, %v954_v56 }
  0x28   :  { %v948_v19 = vpop.eup %696  ;;  %716 = vpow2.f32 %v634_v11  ;;  %v87_v32 = vadd.f32 1.0, %v695_v17  ;;  %v433_v17 = vrot.slane %v933_v6, %v954_v56 }
  0x29   :  { %v950_v21 = vpop.eup %698  ;;  %718 = vpow2.f32 %v640_v14  ;;  %v158_v14 = vmul.f32 1.442695, %v869_v33  ;;  %v975_v23 = vmul.f32 %v919_v0, %v409_v8 }
  0x2a   :  { %v952_v24 = vpop.eup %700  ;;  %720 = vpow2.f32 %v641_v16  ;;  %v413_v16 = vrot.slane %v927_v3, %v954_v56 }
  0x2b   :  { %v703_v26 = vpop.eup %702  ;;  %722 = vpow2.f32 %v646_v18  ;;  %v437_v18 = vrot.slane %v939_v9, %v954_v56 }
  0x2c   :  { %v705_v28 = vpop.eup %704  ;;  %724 = vpow2.f32 %v647_v20  ;;  %v246_v36 = vadd.f32 1.0, %v703_v26 }
  0x2d   :  { %v707_v30 = vpop.eup %706  ;;  %726 = vrcp.f32 %v257_v22  ;;  %v247_v39 = vadd.f32 1.0, %v705_v28  ;;  %v168_v22 = vmul.f32 1.442695, %v874_v35  ;;  %v989_v35 = vmul.f32 1.442695, %v917_v63 }
  0x2e   :  { %v709_v34 = vpop.eup %708  ;;  %728 = vrcp.f32 %v80_v25  ;;  %v252_v41 = vadd.f32 1.0, %v707_v30  ;;  %v170_v25 = vmul.f32 1.442695, %v879_v37  ;;  %v162_v30 = vmul.f32 1.442695, %v912_v60 }
  0x2f   :  { %v711_v38 = vpop.eup %710  ;;  %730 = vrcp.f32 %v81_v27  ;;  %v253_v44 = vadd.f32 1.0, %v709_v34  ;;  %v984_v27 = vld.sshfl [vmem:[%s1249_s0] sm:$0x33 pattern:$0x76325410]  ;;  %v994_v37 = vmul.f32 %v927_v3, %v413_v16  ;;  %v1000_v34 = vmul.f32 %v933_v6, %v433_v17  ;;  %s801_s0 = smov [#allocation2]  }
  0x30   :  { %v713_v40 = vpop.eup %712  ;;  %732 = vrcp.f32 %v86_v29  ;;  %v82_v47 = vadd.f32 1.0, %v711_v38  ;;  %1262 = vst [vmem:[#allocation7_spill] sm:$0xff] %v984_v27  ;;  %v160_v29 = vmul.f32 1.442695, %v907_v57  ;;  %v1009_v63 = vmul.f32 1.442695, %v924_v1 }
  0x31   :  { %v715_v42 = vpop.eup %714  ;;  %734 = vrcp.f32 %v87_v32  ;;  %v83_v50 = vadd.f32 1.0, %v713_v40  ;;  %v997_v32 = vmul.f32 %v948_v19, %v409_v8  ;;  %v1013_v38 = vcombine.high %v984_v27, %v984_v27  ;;  %s614_s13 = sshll.u32 %s801_s0, 4  ;;  %s615_s13 = int_to_ptr.vmem [resolvable:$true] %s614_s13 }
  0x32   :  { %v717_v45 = vpop.eup %716  ;;  %736 = vrcp.f32 %v246_v36  ;;  %v88_v53 = vadd.f32 1.0, %v715_v42  ;;  %v1003_v36 = vmul.f32 %v939_v9, %v437_v18  ;;  %v1021_v40 = vmul.f32 %v952_v24, %v433_v17  ;;  %s776_s14 = scalar_lea.vmem %s615_s13, 1536  ;;  %p781_p1 = scmp.lt.s32.totalorder %s615_s13, %s615_s13 }
  0x33   :  { %v719_v48 = vpop.eup %718  ;;  %738 = vrcp.f32 %v247_v39  ;;  %v89_v58 = vadd.f32 1.0, %v717_v45  ;;  %1263 = vst [vmem:[#allocation8_spill] sm:$0xff] %v1013_v38  ;;  %v1018_v39 = vmul.f32 %v950_v21, %v413_v16  ;;  %v538_v24 = vrot.slane %v994_v37, 1  ;;  %p777_p0 = scmp.ne.s32.totalorder %s615_s13, %s776_s14  ;;  %p782_p2 = scmp.lt.s32.totalorder %s776_s14, %s776_s14 }
  0x34   :  { %v721_v51 = vpop.eup %720  ;;  %740 = vrcp.f32 %v252_v41  ;;  %v248_v61 = vadd.f32 1.0, %v719_v48  ;;  %v556_v48 = vrot.slane %v1003_v36, 1 }
  0x35   :  { %v723_v54 = vpop.eup %722  ;;  %742 = vrcp.f32 %v253_v44  ;;  %v249_v2 = vadd.f32 1.0, %v721_v51  ;;  %p783_p3 = por %p782_p2, %p781_p1 }
  0x36   :  { %v725_v59 = vpop.eup %724  ;;  %744 = vrcp.f32 %v82_v47  ;;  %v254_v5 = vadd.f32 1.0, %v723_v54  ;;  %v553_v47 = vrot.slane %v1000_v34, 1 }
  0x37   :  { %v727_v62 = vpop.eup %726  ;;  %746 = vrcp.f32 %v83_v50  ;;  %v255_v10 = vadd.f32 1.0, %v725_v59  ;;  %v536_v50 = vrot.slane %v997_v32, 1  ;;  %p784_p4 = pnand %p783_p3, %p777_p0 }
  0x38   :  { %v956_v4 = vpop.eup %728  ;;  %748 = vrcp.f32 %v88_v53  ;;  %v1023_v41 = vmul.f32 %v727_v62, %v437_v18 }
  0x39   :  { %v958_v7 = vpop.eup %730  ;;  %750 = vrcp.f32 %v89_v58  ;;  %v393_v26 = vrot.slane %v956_v4, %v954_v56 }
  0x3a   :  { %v962_v11 = vpop.eup %732  ;;  %752 = vrcp.f32 %v248_v61  ;;  %v397_v1 = vrot.slane %v958_v7, %v954_v56  ;;  %v557_v8 = vrot.slane %v1023_v41, 1 }
  0x3b   :  { %v965_v13 = vpop.eup %734  ;;  %754 = vrcp.f32 %v249_v2  ;;  %v1026_v42 = vmul.f32 %v956_v4, %v393_v26  ;;  %v417_v44 = vrot.slane %v962_v11, %v954_v56  ;;  %v539_v2 = vrot.slane %v1018_v39, 1 }
  0x3c   :  { %v737_v15 = vpop.eup %736  ;;  %756 = vrcp.f32 %v254_v5  ;;  %v421_v21 = vrot.slane %v965_v13, %v954_v56  ;;  %v554_v5 = vrot.slane %v1021_v40, 1 }
  0x3d   :  { %v739_v20 = vpop.eup %738  ;;  %758 = vrcp.f32 %v255_v10  ;;  %v523_v62 = vrot.slane %v1026_v42, 1  ;;  %v440_v18 = vmul.f32 %v737_v15, %v393_v26 }
  0x3e   :  { %v741_v33 = vpop.eup %740  ;;  %760 = vpow2.f32 %v156_v12  ;;  %v439_v12 = vmul.f32 %v958_v7, %v397_v1  ;;  %v451_v16 = vmul.f32 %v965_v13, %v421_v21 }
  0x3f   :  { %v743_v28 = vpop.eup %742  ;;  %762 = vpow2.f32 %v158_v14  ;;  %v450_v14 = vmul.f32 %v962_v11, %v417_v44 }
  0x40   :  { %v991_v31 = vpop.eup %744  ;;  %764 = vpow2.f32 %v168_v22  ;;  %v452_v22 = vmul.f32 %v741_v33, %v417_v44  ;;  %v544_v15 = vrot.slane %v451_v16, 1 }
  0x41   :  { %v1005_v57 = vpop.eup %746  ;;  %766 = vpow2.f32 %v170_v25  ;;  %v401_v53 = vrot.slane %v991_v31, %v954_v56  ;;  %v453_v25 = vmul.f32 %v743_v28, %v421_v21  ;;  %v541_v27 = vrot.slane %v450_v14, 1 }
  0x42   :  { %v1015_v19 = vpop.eup %748  ;;  %v405_v54 = vrot.slane %v1005_v57, %v954_v56  ;;  %768 = vpow2.f32 %v160_v29  ;;  %v526_v29 = vrot.slane %v439_v12, 1  ;;  %v542_v26 = vrot.slane %v452_v22, 1 }
  0x43   :  { %1264 = vst [vmem:[#allocation9_spill] sm:$0xff] %v1015_v19  ;;  %v1028_v43 = vpop.eup %750  ;;  %v425_v58 = vrot.slane %v1015_v19, %v954_v56  ;;  %v442_v32 = vmul.f32 %v991_v31, %v401_v53  ;;  %770 = vpow2.f32 %v162_v30  ;;  %v545_v28 = vrot.slane %v453_v25, 1  ;;  %v1273_v25 = vld [vmem:[#allocation8_spill] sm:$0xff] }
  0x44   :  { %1265 = vst [vmem:[#allocation10_spill] sm:$0xff] %v1028_v43  ;;  %v753_v45 = vpop.eup %752  ;;  %v429_v59 = vrot.slane %v1028_v43, %v954_v56  ;;  %v441_v56 = vmul.f32 %v739_v20, %v397_v1  ;;  %v443_v34 = vmul.f32 %v1005_v57, %v405_v54  ;;  %v524_v20 = vrot.slane %v440_v18, 1 }
  0x45   :  { %v755_v51 = vpop.eup %754  ;;  %v454_v36 = vmul.f32 %v1015_v19, %v425_v58  ;;  %v444_v40 = vmul.f32 %v753_v45, %v401_v53  ;;  %v529_v44 = vrot.slane %v442_v32, 1  ;;  %772 = vpow2.f32 %v989_v35 }
  0x46   :  { %v757_v61 = vpop.eup %756  ;;  %v455_v39 = vmul.f32 %v1028_v43, %v429_v59  ;;  %v445_v41 = vmul.f32 %v755_v51, %v405_v54  ;;  %v527_v33 = vrot.slane %v441_v56, 1  ;;  %v532_v21 = vrot.slane %v443_v34, 1 }
  0x47   :  { %v759_v10 = vpop.eup %758  ;;  %v456_v42 = vmul.f32 %v757_v61, %v425_v58  ;;  %v547_v9 = vrot.slane %v454_v36, 1  ;;  %v530_v19 = vrot.slane %v444_v40, 1  ;;  %v1266_v53 = vrot.slane %v975_v23, 1 }
  0x48   :  { %v761_v17 = vpop.eup %760  ;;  %v457_v60 = vmul.f32 %v759_v10, %v429_v59  ;;  %v550_v6 = vrot.slane %v455_v39, 1  ;;  %v533_v43 = vrot.slane %v445_v41, 1  ;;  %v1066_v30 = vsel %vm522_vm0, %v538_v24, %v539_v2 }
  0x49   :  { %v763_v37 = vpop.eup %762  ;;  %v548_v45 = vrot.slane %v456_v42, 1  ;;  %v1063_v54 = vsel %vm522_vm0, %v1266_v53, %v536_v50  ;;  %v1069_v58 = vsel %vm522_vm0, %v553_v47, %v554_v5  ;;  %774 = vpow2.f32 %v1009_v63 }
  0x4a   :  { %v765_v38 = vpop.eup %764  ;;  %v551_v51 = vrot.slane %v457_v60, 1  ;;  %v1073_v10 = vsel %vm522_vm0, %v523_v62, %v524_v20  ;;  %v1076_v35 = vsel %vm522_vm0, %v526_v29, %v527_v33  ;;  %v1079_v23 = vsel %vm522_vm0, %v556_v48, %v557_v8 }
  0x4b   :  { %v767_v1 = vpop.eup %766  ;;  %1267 = vst [vmem:[#allocation11_spill] sm:$0xff] %v1079_v23  ;;  %v1082_v2 = vsel %vm522_vm0, %v541_v27, %v542_v26  ;;  %v1085_v47 = vsel %vm522_vm0, %v544_v15, %v545_v28  ;;  %v1088_v63 = vsel %vm522_vm0, %v529_v44, %v530_v19  ;;  %v1091_v62 = vsel %vm522_vm0, %v532_v21, %v533_v43  ;;  %v1269_v33 = vld [vmem:[#allocation10_spill] sm:$0xff] }
  0x4c   :  { %v769_v60 = vpop.eup %768  ;;  %v1094_v5 = vsel %vm522_vm0, %v547_v9, %v548_v45  ;;  %v1097_v48 = vsel %vm522_vm0, %v550_v6, %v551_v51 }
  0x4d   :  { %v771_v16 = vpop.eup %770 }
  0x4f   :  { %v773_v29 = vpop.eup %772 }
  0x53   :  { %v775_v28 = vpop.eup %774 }
  0x81   :  { %v191_v59 = vpop.permute.xlu1 %190  ;;  %v183_v61 = vpop.permute.xlu0 %182 }
  0x82   :  { %v194_v50 = vrot.slane %v191_v59, 6  ;;  %v192_v24 = vrot.slane %v183_v61, 6 }
  0x84   :  { %v1100_v8 = vmul.f32 %v887_v46, %v194_v50  ;;  %v1103_v27 = vmul.f32 %v892_v49, %v194_v50  ;;  %v1106_v12 = vmul.f32 %v897_v52, %v194_v50  ;;  %v1109_v19 = vmul.f32 %v902_v55, %v194_v50 }
  0x85   :  { %v1111_v43 = vmul.f32 %v761_v17, %v192_v24  ;;  %v1113_v14 = vmul.f32 %v763_v37, %v192_v24  ;;  %v1115_v9 = vmul.f32 %v765_v38, %v192_v24  ;;  %v1117_v6 = vmul.f32 %v767_v1, %v192_v24  ;;  %v187_v41 = vpop.permute.xlu0 %186  ;;  %v119_v42 = vpop.permute.xlu1 %118  ;;  %v1270_v38 = vld [vmem:[#allocation5_spill] sm:$0xff]  ;;  %v1272_v37 = vld [vmem:[#allocation7_spill] sm:$0xff] }
  0x86   :  { %v1120_v46 = vmul.f32 0.5, %v1100_v8  ;;  %v1123_v49 = vmul.f32 0.5, %v1103_v27  ;;  %v1126_v52 = vmul.f32 0.5, %v1106_v12  ;;  %v1129_v55 = vmul.f32 0.5, %v1109_v19 }
  0x87   :  { %v282_v34 = vmul.f32 0.5, %v1111_v43  ;;  %v283_v36 = vmul.f32 0.5, %v1113_v14  ;;  %v1142_v39 = vmul.f32 0.5, %v1115_v9  ;;  %v1145_v40 = vmul.f32 0.5, %v1117_v6 }
  0x88   :  { %v193_v51 = vrot.slane %v187_v41, 6  ;;  %v121_v53 = vmul.f32 %v956_v4, %v119_v42  ;;  %v122_v59 = vmul.f32 %v958_v7, %v119_v42  ;;  %v123_v61 = vmul.f32 %v991_v31, %v119_v42  ;;  %v1268_v41 = vld [vmem:[#allocation9_spill] sm:$0xff] }
  0x89   :  { %v306_v1 = vrot.slane %v282_v34, 2  ;;  %v307_v44 = vrot.slane %v283_v36, 2  ;;  %v312_v21 = vrot.slane %v1142_v39, 2  ;;  %v313_v45 = vrot.slane %v1145_v40, 2 }
  0x8a   :  { %v124_v50 = vmul.f32 %v1005_v57, %v119_v42  ;;  %v125_v24 = vmul.f32 %v919_v0, %v119_v42  ;;  %v126_v56 = vmul.f32 %v927_v3, %v119_v42  ;;  %v127_v34 = vmul.f32 %v962_v11, %v119_v42 }
  0x8b   :  { %v200_v36 = vmul.f32 %v769_v60, %v193_v51  ;;  %v201_v18 = vmul.f32 %v771_v16, %v193_v51  ;;  %v206_v39 = vmul.f32 %v773_v29, %v193_v51  ;;  %v207_v26 = vmul.f32 %v775_v28, %v193_v51  ;;  %v1271_v51 = vld [vmem:[#allocation6_spill] sm:$0xff] }
  0x8c   :  { %v128_v40 = vmul.f32 %v965_v13, %v119_v42  ;;  %v129_v4 = vmul.f32 %v1268_v41, %v119_v42  ;;  %v130_v7 = vmul.f32 %v1269_v33, %v119_v42  ;;  %v131_v31 = vmul.f32 %v1270_v38, %v119_v42 }
  0x8d   :  { %v284_v17 = vmul.f32 0.5, %v200_v36  ;;  %v285_v57 = vmul.f32 0.5, %v201_v18  ;;  %v290_v20 = vmul.f32 0.5, %v206_v39  ;;  %v291_v0 = vmul.f32 0.5, %v207_v26 }
  0x8e   :  { %v356_v15 = vrot.slane %v200_v36, 2  ;;  %v357_v3 = vrot.slane %v201_v18, 2  ;;  %v362_v32 = vrot.slane %v206_v39, 2  ;;  %v363_v11 = vrot.slane %v207_v26, 2 }
  0x8f   :  { %v308_v60 = vrot.slane %v284_v17, 2  ;;  %v309_v16 = vrot.slane %v285_v57, 2  ;;  %v314_v29 = vrot.slane %v290_v20, 2  ;;  %v315_v28 = vrot.slane %v291_v0, 2 }
  0x90   :  { %v132_v13 = vmul.f32 %v1271_v51, %v119_v42  ;;  %v144_v41 = vadd.f32 %v1272_v37, %v121_v53  ;;  %v145_v33 = vadd.f32 %v1273_v25, %v122_v59  ;;  %v146_v38 = vadd.f32 %v1272_v37, %v123_v61 }
  0x91   :  { %v147_v22 = vadd.f32 %v1273_v25, %v124_v50  ;;  %v148_v36 = vadd.f32 %v1272_v37, %v125_v24  ;;  %v149_v18 = vadd.f32 %v1273_v25, %v126_v56  ;;  %v150_v17 = vadd.f32 %v1272_v37, %v127_v34 }
  0x92   :  { %v151_v20 = vadd.f32 %v1273_v25, %v128_v40  ;;  %v152_v26 = vadd.f32 %v1272_v37, %v129_v4  ;;  %v153_v42 = vadd.f32 %v1273_v25, %v130_v7  ;;  %v154_v53 = vadd.f32 %v1272_v37, %v131_v31 }
  0x93   :  { %v155_v59 = vadd.f32 %v1273_v25, %v132_v13  ;;  %v330_v61 = vsub.f32 %v144_v41, %v306_v1  ;;  %v331_v39 = vsub.f32 %v145_v33, %v307_v44  ;;  %v332_v57 = vsub.f32 %v146_v38, %v308_v60 }
  0x94   :  { %v333_v50 = vsub.f32 %v147_v22, %v309_v16  ;;  %v1274_v24 = vrot.slane %v1120_v46, 2  ;;  %v1275_v34 = vrot.slane %v1123_v49, 2  ;;  %v336_v40 = vsub.f32 %v150_v17, %v312_v21 }
  0x95   :  { %v337_v51 = vsub.f32 %v151_v20, %v313_v45  ;;  %v338_v4 = vsub.f32 %v152_v26, %v314_v29  ;;  %v339_v23 = vsub.f32 %v153_v42, %v315_v28  ;;  %v1276_v7 = vrot.slane %v1126_v52, 2 }
  0x96   :  { %v334_v56 = vsub.f32 %v148_v36, %v1274_v24  ;;  %v335_v0 = vsub.f32 %v149_v18, %v1275_v34  ;;  %v1277_v25 = vrot.slane %v1129_v55, 2  ;;  %v1278_v44 = vrot.slane %v1111_v43, 2 }
  0x97   :  { %v340_v37 = vsub.f32 %v154_v53, %v1276_v7  ;;  %v1279_v22 = vrot.slane %v1113_v14, 2  ;;  %v380_v60 = vadd.f32 %v356_v15, %v332_v57  ;;  %v381_v16 = vadd.f32 %v357_v3, %v333_v50 }
  0x98   :  { %v341_v1 = vsub.f32 %v155_v59, %v1277_v25  ;;  %v378_v31 = vadd.f32 %v1278_v44, %v330_v61  ;;  %v1280_v49 = vrot.slane %v1100_v8, 2  ;;  %v1281_v45 = vrot.slane %v1103_v27, 2 }
  0x99   :  { %v379_v46 = vadd.f32 %v1279_v22, %v331_v39  ;;  %v1282_v52 = vrot.slane %v1115_v9, 2  ;;  %v1283_v55 = vrot.slane %v1117_v6, 2  ;;  %v386_v41 = vadd.f32 %v362_v32, %v338_v4 }
  0x9a   :  { %v382_v21 = vadd.f32 %v1280_v49, %v334_v56  ;;  %v383_v29 = vadd.f32 %v1281_v45, %v335_v0  ;;  %v387_v43 = vadd.f32 %v363_v11, %v339_v23  ;;  %v1284_v33 = vrot.slane %v1106_v12, 2 }
  0x9b   :  { %v384_v28 = vadd.f32 %v1282_v52, %v336_v40  ;;  %v385_v13 = vadd.f32 %v1283_v55, %v337_v51  ;;  %v1285_v15 = vrot.slane %v1109_v19, 2  ;;  %v474_v38 = vrot.slane %v378_v31, 6 }
  0x9c   :  { %v388_v14 = vadd.f32 %v1284_v33, %v340_v37  ;;  %v475_v8 = vrot.slane %v379_v46, 6  ;;  %v476_v36 = vrot.slane %v380_v60, 6  ;;  %v477_v18 = vrot.slane %v381_v16, 6 }
  0x9d   :  { %v389_v3 = vadd.f32 %v1285_v15, %v341_v1  ;;  %v478_v27 = vrot.slane %v382_v21, 6  ;;  %v479_v17 = vrot.slane %v383_v29, 6  ;;  %v480_v20 = vrot.slane %v384_v28, 6 }
  0x9e   :  { %v481_v9 = vrot.slane %v385_v13, 6  ;;  %v482_v26 = vrot.slane %v386_v41, 6  ;;  %v483_v42 = vrot.slane %v387_v43, 6  ;;  %v484_v6 = vrot.slane %v388_v14, 6 }
  0x9f   :  { %v485_v53 = vrot.slane %v389_v3, 6  ;;  %v572_v32 = vsel %vm571_vm1, %v330_v61, %v474_v38  ;;  %v573_v12 = vsel %vm571_vm1, %v331_v39, %v475_v8  ;;  %v574_v11 = vsel %vm571_vm1, %v332_v57, %v476_v36 }
  0xa0   :  { %v575_v19 = vsel %vm571_vm1, %v333_v50, %v477_v18  ;;  %v576_v59 = vsel %vm571_vm1, %v334_v56, %v478_v27  ;;  %v577_v24 = vsel %vm571_vm1, %v335_v0, %v479_v17  ;;  %v578_v34 = vsel %vm571_vm1, %v336_v40, %v480_v20 }
  0xa1   :  { %v579_v7 = vsel %vm571_vm1, %v337_v51, %v481_v9  ;;  %v580_v25 = vsel %vm571_vm1, %v338_v4, %v482_v26  ;;  %v581_v44 = vsel %vm571_vm1, %v339_v23, %v483_v42  ;;  %v582_v61 = vsel %vm571_vm1, %v340_v37, %v484_v6 }
  0xa2   :  { %v583_v39 = vsel %vm571_vm1, %v341_v1, %v485_v53  ;;  %v585_v57 = vsel %vm584_vm2, %v572_v32, %v1073_v10  ;;  %v586_v50 = vsel %vm584_vm2, %v573_v12, %v1076_v35  ;;  %v587_v56 = vsel %vm584_vm2, %v574_v11, %v1088_v63 }
  0xa3   :  { %v588_v0 = vsel %vm584_vm2, %v575_v19, %v1091_v62  ;;  %v589_v23 = vsel %vm584_vm2, %v576_v59, %v1063_v54  ;;  %v590_v40 = vsel %vm584_vm2, %v577_v24, %v1066_v30  ;;  %v591_v51 = vsel %vm584_vm2, %v578_v34, %v1082_v2  ;;  %597 = vst [vmem:[#allocation2] sm:$0xff] %v585_v57  ;;  %v1286_v30 = vld [vmem:[#allocation11_spill] sm:$0xff] }
  0xa4   :  { %598 = vst [vmem:[#allocation2 + $0x8] sm:$0xff] %v586_v50  ;;  %599 = vst [vmem:[#allocation2 + $0x10] sm:$0xff] %v587_v56  ;;  %v592_v10 = vsel %vm584_vm2, %v579_v7, %v1085_v47  ;;  %v593_v35 = vsel %vm584_vm2, %v580_v25, %v1094_v5  ;;  %v594_v63 = vsel %vm584_vm2, %v581_v44, %v1097_v48 }
  0xa5   :  { %v595_v54 = vsel %vm584_vm2, %v582_v61, %v1069_v58  ;;  %600 = vst [vmem:[#allocation2 + $0x18] sm:$0xff] %v588_v0  ;;  %601 = vst [vmem:[#allocation2 + $0x20] sm:$0xff] %v589_v23  ;;  %v596_v2 = vsel %vm584_vm2, %v583_v39, %v1286_v30 }
  0xa6   :  { %602 = vst [vmem:[#allocation2 + $0x28] sm:$0xff] %v590_v40  ;;  %603 = vst [vmem:[#allocation2 + $0x30] sm:$0xff] %v591_v51 }
  0xa7   :  { %604 = vst [vmem:[#allocation2 + $0x38] sm:$0xff] %v592_v10  ;;  %605 = vst [vmem:[#allocation2 + $0x40] sm:$0xff] %v593_v35 }
  0xa8   :  { %606 = vst [vmem:[#allocation2 + $0x48] sm:$0xff] %v594_v63  ;;  %607 = vst [vmem:[#allocation2 + $0x50] sm:$0xff] %v595_v54 }
  0xa9   :  { %608 = vst [vmem:[#allocation2 + $0x58] sm:$0xff] %v596_v2 }
  0xaa   :  { %787 = shalt.err (!%p784_p4)
}
  0xab   :  { %s788_s17 = scalar_lea.hbm %s1252_s3, 1536 }
  0xac   :  { %p789_p5 = scmp.ne.s32.totalorder %s1252_s3, %s788_s17  ;;  %p792_p6 = scmp.lt.u32.totalorder %s788_s17, %s1252_s3 }
  0xae   :  { %p794_p7 = pnand %p792_p6, %p789_p5 }
  0xb0   :  { %797 = shalt.err (!%p794_p7)
}
  0xb1   :  { %s802_s22 = smov 256   ;;  %s803_s23 = smov 16  }
  0xb2   :  { %620 = dma.vmem_to_hbm [thread:$0]  %s615_s13, 1536, %s1252_s3, [#allocation3], %s802_s22, %s802_s22, %s803_s23  }
  0xb3   :  { %798 = dma.done.wait [#allocation3], 1536  }
  0xb4   :  { %799 = vsyncadd [#allocation3], 4294965760 }
  0xb5   :  { %624 = vsyncpa [#allocation3], 1 }

</bundles_post_ra>
